<compile_context>
chip_gen: v6e
topology: v6e:2x2x1
jax: 0.10.0
libtpu: 0.0.40
codegen_flags: <defaults>
</compile_context>

<pallas_src>
import functools

import jax
import jax.numpy as jnp
from jax.experimental import pallas as pl
from jax.experimental.pallas import tpu as pltpu

_MIN_TM = 16  # bf16 sublane-packing minimum for the M (sublane) tile.


def _round_up(x, m):
    return ((x + m - 1) // m) * m


def _patch_embed_kernel(p_ref, w_ref, b_ref, o_ref):
    # (tm, K) @ (K, E) on the MXU, f32 accumulate, f32 bias add, cast to out dtype.
    acc = jnp.dot(p_ref[...], w_ref[...], preferred_element_type=jnp.float32)
    o_ref[...] = (acc + b_ref[...]).astype(o_ref.dtype)


def _pick_block_m(K, E, in_bytes, out_bytes, vmem_budget=24 * 1024 * 1024):
    """Largest M-tile (multiple of 256, capped at 4096) whose double-buffered
    in/out rows plus the resident weight/bias fit a conservative VMEM budget."""
    resident = 2 * (K * E * in_bytes + E * 4)           # weight + bias (2 buffers)
    per_row = 2 * (K * in_bytes + E * out_bytes)        # double-buffered P row + out row
    tm = (vmem_budget - resident) // per_row
    tm = max(256, (tm // 256) * 256)
    return int(min(tm, 4096))


def audio_patch_embed(x, weight, bias, patch_size, *, block_m=None,
                      compute_dtype=jnp.bfloat16, out_dtype=None):
    """x: (B, C, H, W); weight: (E, C, ph, pw); bias: (E,).

    Returns (B, nH*nW, E), matching the PyTorch module's forward.  Output
    dtype defaults to compute_dtype (bf16); pass out_dtype=jnp.float32 for
    PyTorch-dtype parity.  Note: P and W are fed to the MXU in compute_dtype
    (f32 accumulation), so results match a pure-f32 Conv2d only to ~1e-3.
    """
    B, C, H, W = x.shape
    ph, pw = patch_size
    E = weight.shape[0]
    nH, nW = H // ph, W // pw
    if (nH * ph, nW * pw) != (H, W):
        # Conv2d with stride==kernel silently drops the remainder rows/cols.
        x = x[:, :, :nH * ph, :nW * pw]
    M = B * nH * nW
    K = C * ph * pw
    if out_dtype is None:
        out_dtype = compute_dtype

    # --- glue: cast first (bf16 materialization), then extract patches ---
    xq = x.astype(compute_dtype)
    patches = xq.reshape(B, C, nH, ph, nW, pw)
    patches = patches.transpose(0, 2, 4, 1, 3, 5)        # (B, nH, nW, C, ph, pw)
    patches = patches.reshape(M, K)                      # (M, K) in compute_dtype

    # --- glue: flatten conv weight to a (K, E) matmul weight (tiny tensor) ---
    w_mat = weight.reshape(E, K).T.astype(compute_dtype)  # (K, E)
    b_mat = bias.reshape(1, E).astype(jnp.float32)         # (1, E), f32 bias add

    in_bytes = jnp.dtype(compute_dtype).itemsize
    out_bytes = jnp.dtype(out_dtype).itemsize
    if block_m is None:
        block_m = _pick_block_m(K, E, in_bytes, out_bytes)
    # bf16 sublane packing: M tile must be a multiple of 16.
    block_m = max(_MIN_TM, _round_up(int(block_m), _MIN_TM))
    # Megacore (v7x): guarantee >= 2 (roughly balanced) grid steps when there
    # is enough work, so the "parallel" M axis shards across both TensorCores.
    if M >= 1024:
        block_m = min(block_m, _round_up(pl.cdiv(M, 2), 256))
    tm = M if block_m >= M else block_m
    grid_m = pl.cdiv(M, tm)

    cost = pl.CostEstimate(
        flops=2 * M * K * E,
        transcendentals=0,
        bytes_accessed=M * K * in_bytes + K * E * in_bytes
                       + M * E * out_bytes + E * 4,
    )

    out = pl.pallas_call(
        _patch_embed_kernel,
        out_shape=jax.ShapeDtypeStruct((M, E), out_dtype),
        grid=(grid_m,),
        in_specs=[
            pl.BlockSpec((tm, K), lambda i: (i, 0)),     # P tiles walk M
            pl.BlockSpec((K, E), lambda i: (0, 0)),      # weight stays resident
            pl.BlockSpec((1, E), lambda i: (0, 0)),      # bias stays resident
        ],
        out_specs=pl.BlockSpec((tm, E), lambda i: (i, 0)),
        compiler_params=pltpu.CompilerParams(
            dimension_semantics=("parallel",),           # megacore-shardable on v7x
            vmem_limit_bytes=32 * 1024 * 1024,           # v5e default is 16 MiB
        ),
        cost_estimate=cost,
    )(patches, w_mat, b_mat)

    return out.reshape(B, nH * nW, E)


def _reference(x, weight, bias, patch_size, compute_dtype=jnp.bfloat16):
    """Pure-JAX reference: f32 conv on the same compute_dtype-quantized operands."""
    ph, pw = patch_size
    xq = x.astype(compute_dtype).astype(jnp.float32)
    wq = weight.astype(compute_dtype).astype(jnp.float32)
    y = jax.lax.conv_general_dilated(
        xq, wq, window_strides=(ph, pw), padding="VALID",
        dimension_numbers=("NCHW", "OIHW", "NCHW"),
        precision=jax.lax.Precision.HIGHEST)
    y = y + bias.reshape(1, -1, 1, 1).astype(jnp.float32)
    B, E, nH, nW = y.shape
    return y.reshape(B, E, nH * nW).transpose(0, 2, 1)


if __name__ == "__main__":
    key = jax.random.PRNGKey(0)
    kx, kw, kb, kx2, kw2, kb2 = jax.random.split(key, 6)

    # --- Config 1: B=2, C=1 audio spectrogram 64x64, patch 16x16, E=128. ---
    # block_m=16 forces a multi-step grid (M=32 -> 2 steps) to exercise tiling.
    B, C, H, W = 2, 1, 64, 64
    patch_size = (16, 16)
    E1 = 128

    x = jax.random.normal(kx, (B, C, H, W), dtype=jnp.float32)
    weight = 0.02 * jax.random.normal(kw, (E1, C, *patch_size), dtype=jnp.float32)
    bias = 0.01 * jax.random.normal(kb, (E1,), dtype=jnp.float32)

    fn = jax.jit(functools.partial(audio_patch_embed,
                                   patch_size=patch_size, block_m=16))
    out = jax.block_until_ready(fn(x, weight, bias))

    ref = _reference(x, weight, bias, patch_size)
    nH, nW = H // patch_size[0], W // patch_size[1]
    assert out.shape == (B, nH * nW, E1)
    assert out.dtype == jnp.bfloat16
    err = float(jnp.max(jnp.abs(out.astype(jnp.float32) - ref)))
    assert err < 2e-2, err

    # --- Config 2: E not a multiple of 128, uneven M tiling, f32 output. ---
    H2, W2, E2 = 80, 64, 96                     # M = 2*5*4 = 40 -> tiles 16,16,8
    x2 = jax.random.normal(kx2, (B, C, H2, W2), dtype=jnp.float32)
    w2 = 0.02 * jax.random.normal(kw2, (E2, C, *patch_size), dtype=jnp.float32)
    b2 = 0.01 * jax.random.normal(kb2, (E2,), dtype=jnp.float32)

    fn2 = jax.jit(functools.partial(audio_patch_embed, patch_size=patch_size,
                                    block_m=16, out_dtype=jnp.float32))
    out2 = jax.block_until_ready(fn2(x2, w2, b2))

    ref2 = _reference(x2, w2, b2, patch_size)
    nH2, nW2 = H2 // patch_size[0], W2 // patch_size[1]
    assert out2.shape == (B, nH2 * nW2, E2)
    assert out2.dtype == jnp.float32
    err2 = float(jnp.max(jnp.abs(out2 - ref2)))
    assert err2 < 2e-2, err2

    print("KERNEL_OK")
</pallas_src>

<mosaic_0001>
module attributes {stable_mosaic.version = 11 : i64} {
  func.func @_patch_embed_kernel(%arg0: i32, %arg1: memref<16x256xbf16, #tpu.memory_space<vmem>>, %arg2: memref<256x128xbf16, #tpu.memory_space<vmem>>, %arg3: memref<1x128xf32, #tpu.memory_space<vmem>>, %arg4: memref<16x128xbf16, #tpu.memory_space<vmem>>) attributes {dimension_semantics = [#tpu.dimension_semantics<parallel>], iteration_bounds = array<i64: 2>, scalar_prefetch = 0 : i64, scratch_operands = 0 : i64, tpu.core_type = #tpu.core_type<tc>, window_params = [{transform_indices = @transform_0, window_bounds = array<i64: 16, 256>}, {pipeline_mode = #tpu.pipeline_mode<synchronous>, transform_indices = @transform_1, window_bounds = array<i64: 256, 128>}, {pipeline_mode = #tpu.pipeline_mode<synchronous>, transform_indices = @transform_2, window_bounds = array<i64: 1, 128>}, {transform_indices = @transform_3, window_bounds = array<i64: 16, 128>}]} {
    %c0 = arith.constant 0 : index
    %c0_0 = arith.constant 0 : index
    %0 = vector.load %arg1[%c0, %c0_0] : memref<16x256xbf16, #tpu.memory_space<vmem>>, vector<16x256xbf16>
    %c0_1 = arith.constant 0 : index
    %c0_2 = arith.constant 0 : index
    %1 = vector.load %arg2[%c0_1, %c0_2] : memref<256x128xbf16, #tpu.memory_space<vmem>>, vector<256x128xbf16>
    %cst = arith.constant dense<0.000000e+00> : vector<16x128xf32>
    %2 = tpu.matmul %0, %1, %cst {dimension_numbers = #tpu.dot_dimension_numbers<[1], [0], [0], [1], [0, 0, 1, 1], [], []>} : vector<16x256xbf16>, vector<256x128xbf16>, vector<16x128xf32> -> vector<16x128xf32>
    %c0_3 = arith.constant 0 : index
    %c0_4 = arith.constant 0 : index
    %3 = vector.load %arg3[%c0_3, %c0_4] : memref<1x128xf32, #tpu.memory_space<vmem>>, vector<1x128xf32>
    %4 = vector.broadcast %3 : vector<1x128xf32> to vector<16x128xf32>
    %5 = arith.addf %2, %4 : vector<16x128xf32>
    %6 = arith.truncf %5 : vector<16x128xf32> to vector<16x128xbf16>
    %c0_5 = arith.constant 0 : index
    %c0_6 = arith.constant 0 : index
    %7 = vector.load %arg4[%c0_5, %c0_6] : memref<16x128xbf16, #tpu.memory_space<vmem>>, vector<16x128xbf16>
    tpu.vector_store %arg4[%c0_5, %c0_6], %6 {strides = array<i32>} : memref<16x128xbf16, #tpu.memory_space<vmem>>, vector<16x128xbf16>,
    return
  }
  func.func @transform_0(%arg0: i32) -> (i32, i32) {
    %c0_i32 = arith.constant 0 : i32
    %c0_i32_0 = arith.constant 0 : i32
    return %arg0, %c0_i32 : i32, i32
  }
  func.func @transform_1(%arg0: i32) -> (i32, i32) {
    %c0_i32 = arith.constant 0 : i32
    %c0_i32_0 = arith.constant 0 : i32
    %c0_i32_1 = arith.constant 0 : i32
    return %c0_i32, %c0_i32_0 : i32, i32
  }
  func.func @transform_2(%arg0: i32) -> (i32, i32) {
    %c0_i32 = arith.constant 0 : i32
    %c0_i32_0 = arith.constant 0 : i32
    %c0_i32_1 = arith.constant 0 : i32
    return %c0_i32, %c0_i32_0 : i32, i32
  }
  func.func @transform_3(%arg0: i32) -> (i32, i32) {
    %c0_i32 = arith.constant 0 : i32
    %c0_i32_0 = arith.constant 0 : i32
    return %arg0, %c0_i32 : i32, i32
  }
}

</mosaic_0001>

<bundles_post_ra>
// kernel: audio_patch_embed.1
= control target key start
LH: loop header
LB: loop body
LE: loop exit
PB: predicated region body
PF: predicated region fallthrough
CT: control target
= control target key end

     0   :  { %8 = vsyncpa [#allocation3], 0  ;;  %s812_s0 = inlined_call_operand.vmem [shape: bf16[32,256], index: 0, kind: input, shape index: {}]   ;;  %s813_s1 = inlined_call_operand.vmem [shape: bf16[256,128], index: 1, kind: input, shape index: {}]   ;;  %s814_s2 = inlined_call_operand.vmem [shape: f32[1,128], index: 2, kind: input, shape index: {}]   ;;  %s815_s3 = inlined_call_operand.hbm [shape: bf16[32,128], index: 3, kind: output, shape index: {}]  }
   0x1   :  { %10 = vsyncpa [#allocation3 + $0x1], 0  ;;  %s660_s12 = smov 0   ;;  %s662_s13 = smov 0  }
   0x2   :  { %s664_s14 = smov 0   ;;  %s666_s15 = smov 0  }
   0x3 LB: > { %s681_s16 = sadd.s32 4294967295, %s635_s15   ;;  %s450_s17 = sadd.s32 4294967294, %s635_s15   ;;  %s635_s15 = sphi %s666_s15, %s821_s15   ;;  %s631_s14 = sphi %s664_s14, %s820_s14   ;;  %s627_s13 = sphi %s662_s13, %s819_s13   ;;  %s623_s12 = sphi %s660_s12, %s818_s12  }
   0x4   : > { %s685_s18 = sadd.s32 1, %s635_s15   ;;  %s91_s19 = sadd.s32 1, %s631_s14 }
   0x5   : > { %s88_s20 = ssub.s32 %s635_s15, %s685_s18  ;;  %p101_p0 = scmp.ne.s32.totalorder %s631_s14, %s627_s13 }
   0x6   : > { %p89_p1 = scmp.eq.s32.totalorder %s88_s20, 0  ;;  %p102_p2 = scmp.eq.s32.totalorder %s681_s16, 1 }
   0x7   : > { %p107_p3 = scmp.ne.s32.totalorder %s627_s13, %s623_s12  ;;  %p108_p4 = scmp.eq.s32.totalorder %s450_s17, 1 }
   0x8   : > { %s696_s21 = scalar_select %p89_p1, %s631_s14, %s91_s19  }
   0x9   : > { %p698_p5 = por %p102_p2, %p101_p0  ;;  %p702_p6 = por %p108_p4, %p107_p3 }
   0xa   : > { %p453_p7 = scmp.ge.s32.totalorder %s635_s15, 1  ;;  %p142_p8 = scmp.lt.s32.totalorder %s635_s15, 3 }
   0xc   : > { %p143_p9 = pnand %p453_p7, %p142_p8 }
   0xd   : > { %s455_s26 = sshll.u32 (!%p143_p9), %s681_s16, 1  ;;  %s164_s25 = sand.u32 (!%p143_p9), 1, %s627_s13  }
   0xe   : > { %146 = sbr.rel (%p143_p9) target bundleno = 271 (0x10f), region = 32  ;;  %p168_p10 = scmp.lt.s32.totalorder (!%p143_p9), %s455_s26, 3 }
   0xf   : > { %s454_s27 = sshll.u32 (!%p143_p9), %s164_s25, 3  ;;  %s487_s6 = sshll.u32 (!%p143_p9), %s681_s16, 7 }
  0x10   : > { %s166_s4 = scalar_lea.vmem (!%p143_p9), [#allocation2], %s454_s27  ;;  %s768_s7 = scalar_lea.hbm (!%p143_p9), %s815_s3, %s487_s6 }
  0x11   : > { %s388_s5 = sshll.u32 (!%p143_p9), %s166_s4, 4  ;;  %s772_s8 = scalar_lea.sflag (!%p143_p9), [#allocation3], %s164_s25  ;;  %s770_s5 = int_to_ptr.vmem [resolvable:$true] %s388_s5 }
  0x12   : > { %s575_s9 = scalar_lea.vmem (!%p143_p9), %s770_s5, 128  ;;  %s637_s16 = smov (!%p143_p9), [#allocation2]  }
  0x13   : > { %v556_v0 = vld [vmem:[%s813_s1 + $0x78] sm:$0xff]   ;;  %v558_v2 = vld [vmem:[%s813_s1 + $0x70] sm:$0xff]   ;;  %v560_v4 = vld [vmem:[%s813_s1 + $0x68] sm:$0xff]   ;;  %s823_s26 = smov (!%p168_p10, %s455_s26), 3  ;;  %p576_p11 = scmp.ne.s32.totalorder %s770_s5, %s575_s9 }
  0x14   : > { %v557_v1 = vld [vmem:[%s813_s1 + $0x38] sm:$0xff]   ;;  %493 = vmatprep.subr.bf16.mxu0 %v556_v0  ;;  %v559_v3 = vld [vmem:[%s813_s1 + $0x30] sm:$0xff]   ;;  %v561_v5 = vld [vmem:[%s813_s1 + $0x28] sm:$0xff]   ;;  %s484_s20 = sshll.u32 %s823_s26, 3  ;;  %s579_s10 = sshll.u32 %s637_s16, 4  ;;  %s580_s10 = int_to_ptr.vmem [resolvable:$false] %s579_s10 }
  0x15   : > { %494 = vmatpush3.bf16.msra.mxu0 %v557_v1  ;;  %v562_v6 = vld [vmem:[%s813_s1 + $0x60] sm:$0xff]   ;;  %v564_v8 = vld [vmem:[%s813_s1 + $0x58] sm:$0xff]   ;;  %s172_s29 = scalar_lea.vmem %s812_s0, %s484_s20  ;;  %v566_v10 = vld [vmem:[%s813_s1 + $0x50] sm:$0xff]   ;;  %p577_p12 = pnand %p576_p11, %p698_p5 }
  0x16   : > { %495 = vmatprep.subr.bf16.mxu0 %v558_v2  ;;  %v563_v7 = vld [vmem:[%s813_s1 + $0x20] sm:$0xff]   ;;  %v565_v9 = vld [vmem:[%s813_s1 + $0x18] sm:$0xff]   ;;  %v567_v12 = vld [vmem:[%s813_s1 + $0x10] sm:$0xff]   ;;  %s581_s11 = scalar_lea.vmem %s580_s10, 256  ;;  %p582_p0 = scmp.lt.s32.totalorder %s770_s5, %s580_s10 }
  0x17   : > { %v574_v11 = vld [vmem:[%s172_s29 + $0x4] ss:$8 sps:$4 sm:$0xff]   ;;  %v572_v17 = vld [vmem:[%s172_s29] ss:$8 sps:$4 sm:$0xff]   ;;  %p578_p13 = pneg %p577_p12  ;;  %p583_p1 = scmp.lt.s32.totalorder %s581_s11, %s575_s9 }
  0x18   : > { %355 = vmatprep.mubr.bf16.mxu0 %v574_v11  ;;  %v568_v13 = vld [vmem:[%s813_s1 + $0x48] sm:$0xff]   ;;  %v570_v15 = vld [vmem:[%s813_s1 + $0x40] sm:$0xff]  }
  0x19   : > { %496 = vmatpush3.bf16.msra.mxu0 %v559_v3  ;;  %v569_v14 = vld [vmem:[%s813_s1 + $0x8] sm:$0xff]   ;;  %v571_v16 = vld [vmem:[%s813_s1] sm:$0xff]   ;;  %p584_p2 = por %p583_p1, %p582_p0 }
  0x1a   : > { %497 = vmatprep.subr.bf16.mxu0 %v560_v4  ;;  %v458_v22 = vld [vmem:[%s814_s2] ss:$0 sm:$0xff] }
  0x1b   : > { %p585_p3 = pnand %p584_p2, %p578_p13 }
  0x1d   : > { %498 = vmatpush3.bf16.msra.mxu0 %v561_v5 }
  0x1e   : > { %499 = vmatprep.subr.bf16.mxu0 %v562_v6 }
  0x21   : > { %500 = vmatpush3.bf16.msra.mxu0 %v563_v7 }
  0x22   : > { %501 = vmatprep.subr.bf16.mxu0 %v564_v8 }
  0x25   : > { %502 = vmatpush3.bf16.msra.mxu0 %v565_v9 }
  0x26   : > { %503 = vmatprep.subr.bf16.mxu0 %v566_v10 }
  0x29   : > { %504 = vmatpush3.bf16.msra.mxu0 %v567_v12 }
  0x2a   : > { %505 = vmatprep.subr.bf16.mxu0 %v568_v13 }
  0x2d   : > { %506 = vmatpush3.bf16.msra.mxu0 %v569_v14 }
  0x2e   : > { %507 = vmatprep.subr.bf16.mxu0 %v570_v15 }
  0x31   : > { %508 = vmatpush3.bf16.msra.mxu0 %v571_v16 }
  0x34   : > { %356 = vmatmul.mubr.bf16.vlgmr.msra.gmra.mxu0 %v572_v17 }
  0xf4   : > { %v509_v18 = vpop.f32.mrf.mxu0 }
  0xf6   : > { %v510_v19 = vpop.f32.mrf.mxu0 }
  0xf7   : > { %v511_v21 = vadd.f32 %v510_v19, %v509_v18 }
  0xf8   : > { %v512_v20 = vpop.f32.mrf.mxu0 }
  0xf9   : > { %v358_v25 = vadd.f32 %v511_v21, %v458_v22 }
  0xfa   : > { %v513_v23 = vpop.f32.mrf.mxu0 }
  0xfb   : > { %v514_v24 = vadd.f32 %v513_v23, %v512_v20 }
  0xfd   : > { %v361_v26 = vadd.f32 %v514_v24, %v458_v22 }
  0xff   : > { %v491_v27 = vpack.c.bf16 %v361_v26, %v358_v25 }
 0x101   : > { %492 = vst [vmem:[%s166_s4] sm:$0xff] %v491_v27  }
 0x102   : > { %588 = shalt.err (!%p585_p3)
}
 0x103   : > { %s589_s17 = scalar_lea.hbm %s768_s7, 128  ;;  %s593_s24 = scalar_lea.hbm %s815_s3, 256 }
 0x104   : > { %p590_p4 = scmp.ne.s32.totalorder %s768_s7, %s589_s17  ;;  %p594_p9 = scmp.lt.s32.totalorder %s768_s7, %s815_s3 }
 0x105   : > { %p595_p10 = scmp.lt.s32.totalorder %s593_s24, %s589_s17 }
 0x106   : > { %p591_p7 = pnand %p590_p4, %p698_p5 }
 0x107   : > { %p596_p11 = por %p595_p10, %p594_p9 }
 0x108   : > { %p592_p8 = pneg %p591_p7 }
 0x10a   : > { %p597_p12 = pnand %p596_p11, %p592_p8 }
 0x10c   : > { %600 = shalt.err (!%p597_p12)
}
 0x10d   : > { %s638_s28 = smov 64   ;;  %s639_s30 = smov 4  }
 0x10e   : > { %515 = dma.vmem_to_hbm [thread:$0]  (%p698_p5), %s770_s5, 128, %s768_s7, %s772_s8, %s638_s28, %s638_s28, %s639_s30  }
 0x10f PF: > { %p521_p13 = scmp.ge.s32.totalorder %s635_s15, 2  ;;  %s403_s4 = sand.u32 1, %s623_s12  }
 0x110   : > { %s404_s6 = scalar_lea.sflag [#allocation3], %s403_s4 }
 0x111   : > { %p518_p0 = pnand %p521_p13, %p702_p6 }
 0x113   : > { %p519_p1 = pneg %p518_p0 }
 0x115   : > { %618 = dma.done.wait (%p519_p1), %s404_s6, 128  }
 0x116   : > { %620 = vsyncadd (%p519_p1), %s404_s6, 4294967168  ;;  %p13_p2 = scmp.ge.s32.totalorder %s685_s18, 4   ;;  %s818_s12 = smov %s627_s13 }
 0x117   : > { %s819_s13 = smov %s631_s14  ;;  %s820_s14 = smov %s696_s21 }
 0x118   : > { %s821_s15 = smov %s685_s18  ;;  %15 = sbr.rel (!%p13_p2) target bundleno = 3 (0x3), region = 67 }
 0x11d   :  { %409 = vsyncpa [#allocation3], 1 }
 0x11e   :  { %411 = vsyncpa [#allocation3 + $0x1], 1 }

</bundles_post_ra>
